<compile_context>
chip_gen: v5e
topology: v5e:2x2
jax: 0.10.0
libtpu: 0.0.40
codegen_flags: <defaults>
</compile_context>

<pallas_src>
import functools

import jax
import jax.numpy as jnp
from jax.experimental import pallas as pl
from jax.experimental.pallas import tpu as pltpu


def _round_up(n, m):
    return ((n + m - 1) // m) * m


def _bf16_eup_ok():
    """bf16 transcendentals are native on v6e/v7x EUP; keep f32 on v5e/older."""
    try:
        kind = jax.devices()[0].device_kind.lower()
    except Exception:
        return False
    return not any(v in kind for v in ("v2", "v3", "v4", "v5"))


def _choose_tb(batch):
    """Batch tile: multiple of 8 sublanes, >=2 grid steps when possible (v7x
    megacore), large tiles for big batches to amortize ~0.35us/step overhead."""
    if batch <= 1024:
        return max(8, _round_up(-(-batch // 2), 8))
    if batch >= 4096:
        return 2048
    return 1024


def mlp_kernel(x_ref,
               w1_ref, b1_ref,
               w2_ref, b2_ref,
               w3_ref, b3_ref,
               w4_ref, b4_ref,
               o_ref, *, act_dtype):
    # In-kernel f32 -> bf16 cast of the input tile: free VALU work under
    # MXU/EUP slack; avoids a wrapper-side HBM pad/cast pre-pass.
    x = x_ref[...].astype(jnp.bfloat16)

    def sigmoid(z):
        # sigmoid(z) = 0.5 * tanh(0.5 * z) + 0.5 : one EUP transcendental
        # (vs exp + reciprocal); the mul/add land on idle VALU slots.
        zh = (0.5 * z).astype(act_dtype)   # bf16 EUP on v6e/v7x, f32 on v5e
        return (0.5 * jnp.tanh(zh) + 0.5).astype(jnp.bfloat16)

    z1 = jnp.dot(x, w1_ref[...], preferred_element_type=jnp.float32) + b1_ref[...]
    h1 = sigmoid(z1)

    z2 = jnp.dot(h1, w2_ref[...], preferred_element_type=jnp.float32) + b2_ref[...]
    h2 = sigmoid(z2)

    z3 = jnp.dot(h2, w3_ref[...], preferred_element_type=jnp.float32) + b3_ref[...]
    h3 = sigmoid(z3)

    out = jnp.dot(h3, w4_ref[...], preferred_element_type=jnp.float32) + b4_ref[...]
    o_ref[...] = out.astype(o_ref.dtype)   # bf16 store: halves HBM writeback


def value_state_net_forward(x, params, n_actions):
    """x: (B, 1, input_dim) -> (B, n_actions) float32."""
    x2d = jnp.squeeze(x, axis=1)           # matches input_data.squeeze(1); stays f32
    B, d_in = x2d.shape
    n_pad = params["w4"].shape[1]          # final layer padded to 128 lanes

    tb = _choose_tb(B)
    grid = (pl.cdiv(B, tb),)               # ragged tail block; [:B] discards it

    def resident(shape):
        # Full-array block, constant block index -> DMA'd once, stays in VMEM.
        return pl.BlockSpec(shape, lambda i: (0, 0))

    in_specs = [pl.BlockSpec((tb, d_in), lambda i: (i, 0))]
    args = [x2d]
    for layer in range(1, 5):
        w = params[f"w{layer}"]
        b = params[f"b{layer}"]
        in_specs += [resident(w.shape), resident(b.shape)]
        args += [w, b]

    rows = grid[0] * tb
    flops = 2 * rows * (d_in * 256 + 256 * 256 + 256 * 128 + 128 * n_pad)
    transcendentals = rows * (256 + 256 + 128)   # one tanh per sigmoid
    bytes_accessed = (
        x2d.size * 4
        + sum(params[f"w{l}"].size * 2 + params[f"b{l}"].size * 4
              for l in range(1, 5))
        + rows * n_pad * 2)

    kernel = functools.partial(
        mlp_kernel,
        act_dtype=jnp.bfloat16 if _bf16_eup_ok() else jnp.float32)

    out = pl.pallas_call(
        kernel,
        out_shape=jax.ShapeDtypeStruct((B, n_pad), jnp.bfloat16),
        grid=grid,
        in_specs=in_specs,
        out_specs=pl.BlockSpec((tb, n_pad), lambda i: (i, 0)),
        compiler_params=pltpu.CompilerParams(
            dimension_semantics=("parallel",),
            vmem_limit_bytes=32 * 1024 * 1024),
        cost_estimate=pl.CostEstimate(
            flops=flops,
            transcendentals=transcendentals,
            bytes_accessed=bytes_accessed),
    )(*args)

    return out[:B, :n_actions].astype(jnp.float32)


def init_params(key, input_dim, n_actions):
    """Mirrors the PyTorch module's init.

    fc1/fc2/fc3 weights: Xavier-normal; out weight + all biases: PyTorch Linear
    default uniform(+-1/sqrt(fan_in)). Weights stored transposed (in, out) in
    bf16 for the MXU; biases in f32. The final layer's (weight, bias) are
    zero-padded to 128 output lanes for lane-dense, unmasked stores.
    """
    dims = [(input_dim, 256), (256, 256), (256, 128), (128, n_actions)]
    n_pad = _round_up(n_actions, 128)
    keys = jax.random.split(key, 8)
    params = {}
    for i, (fan_in, fan_out) in enumerate(dims, start=1):
        wk, bk = keys[2 * (i - 1)], keys[2 * (i - 1) + 1]
        if i < 4:
            std = jnp.sqrt(2.0 / (fan_in + fan_out))  # xavier_normal_
            w = std * jax.random.normal(wk, (fan_in, fan_out), jnp.float32)
        else:
            bound = 1.0 / jnp.sqrt(fan_in)
            w = jax.random.uniform(wk, (fan_in, fan_out), jnp.float32,
                                   minval=-bound, maxval=bound)
        bound = 1.0 / jnp.sqrt(fan_in)
        b = jax.random.uniform(bk, (1, fan_out), jnp.float32,
                               minval=-bound, maxval=bound)
        if i == 4 and n_pad != fan_out:  # lane-dense output padding
            w = jnp.pad(w, ((0, 0), (0, n_pad - fan_out)))
            b = jnp.pad(b, ((0, 0), (0, n_pad - fan_out)))
        params[f"w{i}"] = w.astype(jnp.bfloat16)
        params[f"b{i}"] = b  # f32 bias for f32 accumulate
    return params


def reference_forward(x, params, n_actions):
    x2d = jnp.squeeze(x, axis=1).astype(jnp.float32)
    w = lambda k: params[k].astype(jnp.float32)
    h = jax.nn.sigmoid(x2d @ w("w1") + params["b1"])
    h = jax.nn.sigmoid(h @ w("w2") + params["b2"])
    h = jax.nn.sigmoid(h @ w("w3") + params["b3"])
    return (h @ w("w4") + params["b4"])[:, :n_actions]


if __name__ == "__main__":
    key = jax.random.PRNGKey(0)
    k_param, k_x = jax.random.split(key)

    B, input_dim, n_actions = 2, 16, 4
    params = init_params(k_param, input_dim, n_actions)
    x = jax.random.normal(k_x, (B, 1, input_dim), jnp.float32)

    fwd = jax.jit(functools.partial(value_state_net_forward,
                                    n_actions=n_actions))
    out = jax.block_until_ready(fwd(x, params))

    ref = jax.block_until_ready(reference_forward(x, params, n_actions))
    assert out.shape == (B, n_actions)
    assert out.dtype == jnp.float32
    # bf16 MXU operands + bf16 activations/output -> bf16-level tolerance.
    assert jnp.allclose(out, ref, atol=2e-2, rtol=2e-2), (
        f"max abs err {jnp.max(jnp.abs(out - ref))}")

    print("KERNEL_OK")
</pallas_src>

<mosaic_0001>
module attributes {stable_mosaic.version = 11 : i64} {
  func.func @mlp_kernel(%arg0: i32, %arg1: memref<8x16xf32, #tpu.memory_space<vmem>>, %arg2: memref<16x256xbf16, #tpu.memory_space<vmem>>, %arg3: memref<1x256xf32, #tpu.memory_space<vmem>>, %arg4: memref<256x256xbf16, #tpu.memory_space<vmem>>, %arg5: memref<1x256xf32, #tpu.memory_space<vmem>>, %arg6: memref<256x128xbf16, #tpu.memory_space<vmem>>, %arg7: memref<1x128xf32, #tpu.memory_space<vmem>>, %arg8: memref<128x128xbf16, #tpu.memory_space<vmem>>, %arg9: memref<1x128xf32, #tpu.memory_space<vmem>>, %arg10: memref<8x128xbf16, #tpu.memory_space<vmem>>) attributes {dimension_semantics = [#tpu.dimension_semantics<parallel>], iteration_bounds = array<i64: 1>, scalar_prefetch = 0 : i64, scratch_operands = 0 : i64, tpu.core_type = #tpu.core_type<tc>, window_params = [{transform_indices = @transform_0, window_bounds = array<i64: 8, 16>}, {pipeline_mode = #tpu.pipeline_mode<synchronous>, transform_indices = @transform_1, window_bounds = array<i64: 16, 256>}, {pipeline_mode = #tpu.pipeline_mode<synchronous>, transform_indices = @transform_2, window_bounds = array<i64: 1, 256>}, {pipeline_mode = #tpu.pipeline_mode<synchronous>, transform_indices = @transform_3, window_bounds = array<i64: 256, 256>}, {pipeline_mode = #tpu.pipeline_mode<synchronous>, transform_indices = @transform_4, window_bounds = array<i64: 1, 256>}, {pipeline_mode = #tpu.pipeline_mode<synchronous>, transform_indices = @transform_5, window_bounds = array<i64: 256, 128>}, {pipeline_mode = #tpu.pipeline_mode<synchronous>, transform_indices = @transform_6, window_bounds = array<i64: 1, 128>}, {pipeline_mode = #tpu.pipeline_mode<synchronous>, transform_indices = @transform_7, window_bounds = array<i64: 128, 128>}, {pipeline_mode = #tpu.pipeline_mode<synchronous>, transform_indices = @transform_8, window_bounds = array<i64: 1, 128>}, {transform_indices = @transform_9, window_bounds = array<i64: 8, 128>}]} {
    %c0 = arith.constant 0 : index
    %c0_0 = arith.constant 0 : index
    %0 = vector.load %arg1[%c0, %c0_0] : memref<8x16xf32, #tpu.memory_space<vmem>>, vector<8x16xf32>
    %1 = arith.truncf %0 : vector<8x16xf32> to vector<8x16xbf16>
    %c0_1 = arith.constant 0 : index
    %c0_2 = arith.constant 0 : index
    %2 = vector.load %arg2[%c0_1, %c0_2] : memref<16x256xbf16, #tpu.memory_space<vmem>>, vector<16x256xbf16>
    %cst = arith.constant dense<0.000000e+00> : vector<8x256xf32>
    %3 = tpu.matmul %1, %2, %cst {dimension_numbers = #tpu.dot_dimension_numbers<[1], [0], [0], [1], [0, 0, 1, 1], [], []>} : vector<8x16xbf16>, vector<16x256xbf16>, vector<8x256xf32> -> vector<8x256xf32>
    %c0_3 = arith.constant 0 : index
    %c0_4 = arith.constant 0 : index
    %4 = vector.load %arg3[%c0_3, %c0_4] : memref<1x256xf32, #tpu.memory_space<vmem>>, vector<1x256xf32>
    %5 = vector.broadcast %4 : vector<1x256xf32> to vector<8x256xf32>
    %6 = arith.addf %3, %5 : vector<8x256xf32>
    %cst_5 = arith.constant 5.000000e-01 : f32
    %7 = vector.broadcast %cst_5 : f32 to vector<8x256xf32>
    %8 = arith.mulf %7, %6 : vector<8x256xf32>
    %9 = arith.truncf %8 : vector<8x256xf32> to vector<8x256xbf16>
    %10 = math.tanh %9 : vector<8x256xbf16>
    %cst_6 = arith.constant 5.000000e-01 : bf16
    %11 = vector.broadcast %cst_6 : bf16 to vector<8x256xbf16>
    %12 = arith.mulf %11, %10 : vector<8x256xbf16>
    %cst_7 = arith.constant 5.000000e-01 : bf16
    %13 = vector.broadcast %cst_7 : bf16 to vector<8x256xbf16>
    %14 = arith.addf %12, %13 : vector<8x256xbf16>
    %c0_8 = arith.constant 0 : index
    %c0_9 = arith.constant 0 : index
    %15 = vector.load %arg4[%c0_8, %c0_9] : memref<256x256xbf16, #tpu.memory_space<vmem>>, vector<256x256xbf16>
    %cst_10 = arith.constant dense<0.000000e+00> : vector<8x256xf32>
    %16 = tpu.matmul %14, %15, %cst_10 {dimension_numbers = #tpu.dot_dimension_numbers<[1], [0], [0], [1], [0, 0, 1, 1], [], []>} : vector<8x256xbf16>, vector<256x256xbf16>, vector<8x256xf32> -> vector<8x256xf32>
    %c0_11 = arith.constant 0 : index
    %c0_12 = arith.constant 0 : index
    %17 = vector.load %arg5[%c0_11, %c0_12] : memref<1x256xf32, #tpu.memory_space<vmem>>, vector<1x256xf32>
    %18 = vector.broadcast %17 : vector<1x256xf32> to vector<8x256xf32>
    %19 = arith.addf %16, %18 : vector<8x256xf32>
    %cst_13 = arith.constant 5.000000e-01 : f32
    %20 = vector.broadcast %cst_13 : f32 to vector<8x256xf32>
    %21 = arith.mulf %20, %19 : vector<8x256xf32>
    %22 = arith.truncf %21 : vector<8x256xf32> to vector<8x256xbf16>
    %23 = math.tanh %22 : vector<8x256xbf16>
    %cst_14 = arith.constant 5.000000e-01 : bf16
    %24 = vector.broadcast %cst_14 : bf16 to vector<8x256xbf16>
    %25 = arith.mulf %24, %23 : vector<8x256xbf16>
    %cst_15 = arith.constant 5.000000e-01 : bf16
    %26 = vector.broadcast %cst_15 : bf16 to vector<8x256xbf16>
    %27 = arith.addf %25, %26 : vector<8x256xbf16>
    %c0_16 = arith.constant 0 : index
    %c0_17 = arith.constant 0 : index
    %28 = vector.load %arg6[%c0_16, %c0_17] : memref<256x128xbf16, #tpu.memory_space<vmem>>, vector<256x128xbf16>
    %cst_18 = arith.constant dense<0.000000e+00> : vector<8x128xf32>
    %29 = tpu.matmul %27, %28, %cst_18 {dimension_numbers = #tpu.dot_dimension_numbers<[1], [0], [0], [1], [0, 0, 1, 1], [], []>} : vector<8x256xbf16>, vector<256x128xbf16>, vector<8x128xf32> -> vector<8x128xf32>
    %c0_19 = arith.constant 0 : index
    %c0_20 = arith.constant 0 : index
    %30 = vector.load %arg7[%c0_19, %c0_20] : memref<1x128xf32, #tpu.memory_space<vmem>>, vector<1x128xf32>
    %31 = vector.broadcast %30 : vector<1x128xf32> to vector<8x128xf32>
    %32 = arith.addf %29, %31 : vector<8x128xf32>
    %cst_21 = arith.constant 5.000000e-01 : f32
    %33 = vector.broadcast %cst_21 : f32 to vector<8x128xf32>
    %34 = arith.mulf %33, %32 : vector<8x128xf32>
    %35 = arith.truncf %34 : vector<8x128xf32> to vector<8x128xbf16>
    %36 = math.tanh %35 : vector<8x128xbf16>
    %cst_22 = arith.constant 5.000000e-01 : bf16
    %37 = vector.broadcast %cst_22 : bf16 to vector<8x128xbf16>
    %38 = arith.mulf %37, %36 : vector<8x128xbf16>
    %cst_23 = arith.constant 5.000000e-01 : bf16
    %39 = vector.broadcast %cst_23 : bf16 to vector<8x128xbf16>
    %40 = arith.addf %38, %39 : vector<8x128xbf16>
    %c0_24 = arith.constant 0 : index
    %c0_25 = arith.constant 0 : index
    %41 = vector.load %arg8[%c0_24, %c0_25] : memref<128x128xbf16, #tpu.memory_space<vmem>>, vector<128x128xbf16>
    %cst_26 = arith.constant dense<0.000000e+00> : vector<8x128xf32>
    %42 = tpu.matmul %40, %41, %cst_26 {dimension_numbers = #tpu.dot_dimension_numbers<[1], [0], [0], [1], [0, 0, 1, 1], [], []>} : vector<8x128xbf16>, vector<128x128xbf16>, vector<8x128xf32> -> vector<8x128xf32>
    %c0_27 = arith.constant 0 : index
    %c0_28 = arith.constant 0 : index
    %43 = vector.load %arg9[%c0_27, %c0_28] : memref<1x128xf32, #tpu.memory_space<vmem>>, vector<1x128xf32>
    %44 = vector.broadcast %43 : vector<1x128xf32> to vector<8x128xf32>
    %45 = arith.addf %42, %44 : vector<8x128xf32>
    %46 = arith.truncf %45 : vector<8x128xf32> to vector<8x128xbf16>
    %c0_29 = arith.constant 0 : index
    %c0_30 = arith.constant 0 : index
    %47 = vector.load %arg10[%c0_29, %c0_30] : memref<8x128xbf16, #tpu.memory_space<vmem>>, vector<8x128xbf16>
    tpu.vector_store %arg10[%c0_29, %c0_30], %46 {strides = array<i32>} : memref<8x128xbf16, #tpu.memory_space<vmem>>, vector<8x128xbf16>,
    return
  }
  func.func @transform_0(%arg0: i32) -> (i32, i32) {
    %c0_i32 = arith.constant 0 : i32
    %c0_i32_0 = arith.constant 0 : i32
    return %arg0, %c0_i32 : i32, i32
  }
  func.func @transform_1(%arg0: i32) -> (i32, i32) {
    %c0_i32 = arith.constant 0 : i32
    %c0_i32_0 = arith.constant 0 : i32
    %c0_i32_1 = arith.constant 0 : i32
    return %c0_i32, %c0_i32_0 : i32, i32
  }
  func.func @transform_2(%arg0: i32) -> (i32, i32) {
    %c0_i32 = arith.constant 0 : i32
    %c0_i32_0 = arith.constant 0 : i32
    %c0_i32_1 = arith.constant 0 : i32
    return %c0_i32, %c0_i32_0 : i32, i32
  }
  func.func @transform_3(%arg0: i32) -> (i32, i32) {
    %c0_i32 = arith.constant 0 : i32
    %c0_i32_0 = arith.constant 0 : i32
    %c0_i32_1 = arith.constant 0 : i32
    return %c0_i32, %c0_i32_0 : i32, i32
  }
  func.func @transform_4(%arg0: i32) -> (i32, i32) {
    %c0_i32 = arith.constant 0 : i32
    %c0_i32_0 = arith.constant 0 : i32
    %c0_i32_1 = arith.constant 0 : i32
    return %c0_i32, %c0_i32_0 : i32, i32
  }
  func.func @transform_5(%arg0: i32) -> (i32, i32) {
    %c0_i32 = arith.constant 0 : i32
    %c0_i32_0 = arith.constant 0 : i32
    %c0_i32_1 = arith.constant 0 : i32
    return %c0_i32, %c0_i32_0 : i32, i32
  }
  func.func @transform_6(%arg0: i32) -> (i32, i32) {
    %c0_i32 = arith.constant 0 : i32
    %c0_i32_0 = arith.constant 0 : i32
    %c0_i32_1 = arith.constant 0 : i32
    return %c0_i32, %c0_i32_0 : i32, i32
  }
  func.func @transform_7(%arg0: i32) -> (i32, i32) {
    %c0_i32 = arith.constant 0 : i32
    %c0_i32_0 = arith.constant 0 : i32
    %c0_i32_1 = arith.constant 0 : i32
    return %c0_i32, %c0_i32_0 : i32, i32
  }
  func.func @transform_8(%arg0: i32) -> (i32, i32) {
    %c0_i32 = arith.constant 0 : i32
    %c0_i32_0 = arith.constant 0 : i32
    %c0_i32_1 = arith.constant 0 : i32
    return %c0_i32, %c0_i32_0 : i32, i32
  }
  func.func @transform_9(%arg0: i32) -> (i32, i32) {
    %c0_i32 = arith.constant 0 : i32
    %c0_i32_0 = arith.constant 0 : i32
    return %arg0, %c0_i32 : i32, i32
  }
}

</mosaic_0001>

<bundles_post_ra>
// kernel: value_state_net_forward.1
= control target key start
LH: loop header
LB: loop body
LE: loop exit
PB: predicated region body
PF: predicated region fallthrough
CT: control target
= control target key end

     0   :  { %14 = vsyncpa [#allocation3], 0  ;;  %s1345_s0 = inlined_call_operand.hbm [shape: f32[2,16], index: 0, kind: input, shape index: {}]   ;;  %s1346_s1 = inlined_call_operand.hbm [shape: bf16[16,256], index: 1, kind: input, shape index: {}]   ;;  %s1347_s2 = inlined_call_operand.hbm [shape: f32[1,256], index: 2, kind: input, shape index: {}]   ;;  %s1348_s3 = inlined_call_operand.hbm [shape: bf16[256,256], index: 3, kind: input, shape index: {}]   ;;  %s1349_s4 = inlined_call_operand.vmem [shape: f32[1,256], index: 4, kind: input, shape index: {}]   ;;  %s1350_s5 = inlined_call_operand.hbm [shape: bf16[256,128], index: 5, kind: input, shape index: {}]   ;;  %s1351_s6 = inlined_call_operand.vmem [shape: f32[1,128], index: 6, kind: input, shape index: {}]   ;;  %s1352_s7 = inlined_call_operand.hbm [shape: bf16[128,128], index: 7, kind: input, shape index: {}]   ;;  %s1353_s8 = inlined_call_operand.vmem [shape: f32[1,128], index: 8, kind: input, shape index: {}]   ;;  %s1354_s9 = inlined_call_operand.vmem [shape: bf16[2,128], index: 9, kind: output, shape index: {}]  }
   0x1   :  { %15 = vsyncpa [#allocation5], 0 }
   0x2   :  { %16 = vsyncpa [#allocation8], 0 }
   0x3   :  { %17 = vsyncpa [#allocation11], 0  ;;  %s35_s11 = sshll.u32 %s1346_s1, 4  ;;  %s36_s11 = int_to_ptr.hbm [resolvable:$true] %s35_s11 }
   0x4   :  { %21 = vsyncadd [#allocation3], 96  ;;  %s1253_s12 = smov [#allocation4]   ;;  %s59_s16 = sshll.u32 %s1348_s3, 4  ;;  %s60_s16 = int_to_ptr.hbm [resolvable:$true] %s59_s16 }
   0x5   :  { %s37_s13 = sshll.u32 %s1253_s12, 4  ;;  %s1254_s17 = smov 128   ;;  %s38_s13 = int_to_ptr.vmem [resolvable:$true] %s37_s13 }
   0x6   :  { %s1255_s18 = smov 8   ;;  %s1256_s19 = smov [#allocation7]  }
   0x7   :  { %43 = dma.hbm_to_vmem [thread:$0]  %s36_s11, 256, %s38_s13, [#allocation5], %s1254_s17, %s1254_s17, %s1255_s18  }
   0x8   :  { %s61_s20 = sshll.u32 %s1256_s19, 4  ;;  %s22_s23 = sshll.u32 %s1345_s0, 4  ;;  %s62_s20 = int_to_ptr.vmem [resolvable:$true] %s61_s20  ;;  %s23_s23 = int_to_ptr.hbm [resolvable:$true] %s22_s23 }
   0x9   :  { %67 = dma.hbm_to_vmem [thread:$0]  %s60_s16, 4096, %s62_s20, [#allocation8], %s1254_s17, %s1254_s17, %s1255_s18  }
   0xa   :  { %s1257_s1 = smov [#allocation2]   ;;  %s49_s3 = sshll.u32 %s1347_s2, 4  ;;  %s50_s3 = int_to_ptr.hbm [resolvable:$true] %s49_s3 }
   0xb   :  { %s24_s24 = sshll.u32 %s1257_s1, 4  ;;  %s1258_s27 = smov 32   ;;  %s25_s24 = int_to_ptr.vmem [resolvable:$true] %s24_s24 }
   0xc   :  { %s1259_s28 = smov 2   ;;  %s1260_s29 = smov [#allocation6]  }
   0xd   :  { %30 = dma.hbm_to_vmem [thread:$0]  %s23_s23, 32, %s25_s24, [#allocation3], %s1258_s27, %s1258_s27, %s1259_s28  }
   0xe   :  { %s51_s30 = sshll.u32 %s1260_s29, 4  ;;  %s74_s0 = sshll.u32 %s1350_s5, 4  ;;  %s52_s30 = int_to_ptr.vmem [resolvable:$true] %s51_s30  ;;  %s75_s0 = int_to_ptr.hbm [resolvable:$true] %s74_s0 }
   0xf   :  { %54 = dma.hbm_to_vmem [thread:$0]  %s50_s3, 32, %s52_s30, [#allocation5]  }
  0x10   :  { %s1261_s12 = smov [#allocation9]   ;;  %s89_s2 = sshll.u32 %s1352_s7, 4  ;;  %s90_s2 = int_to_ptr.hbm [resolvable:$true] %s89_s2 }
  0x11   :  { %s76_s13 = sshll.u32 %s1261_s12, 4  ;;  %s1262_s16 = smov 64   ;;  %s77_s13 = int_to_ptr.vmem [resolvable:$true] %s76_s13 }
  0x12   :  { %s1263_s17 = smov 4   ;;  %s1264_s18 = smov [#allocation10]  }
  0x13   :  { %82 = dma.hbm_to_vmem [thread:$0]  %s75_s0, 2048, %s77_s13, [#allocation8], %s1262_s16, %s1262_s16, %s1263_s17  }
  0x14   :  { %s91_s19 = sshll.u32 %s1264_s18, 4  ;;  %s92_s19 = int_to_ptr.vmem [resolvable:$true] %s91_s19 }
  0x15   :  { %97 = dma.hbm_to_vmem [thread:$0]  %s90_s2, 1024, %s92_s19, [#allocation11], %s1262_s16, %s1262_s16, %s1263_s17  }
  0x16   :  { %1245 = dma.done.wait [#allocation3], 128  }
  0x17   :  { %1246 = vsyncadd [#allocation3], 4294967168 }
  0x18   :  { %1247 = dma.done.wait [#allocation5], 288  }
  0x19   :  { %1248 = vsyncadd [#allocation5], 4294967008 }
  0x1a   :  { %1249 = dma.done.wait [#allocation8], 6144  }
  0x1b   :  { %1250 = vsyncadd [#allocation8], 4294961152 }
  0x1c   :  { %1251 = dma.done.wait [#allocation11], 1024  }
  0x1d   :  { %1252 = vsyncadd [#allocation11], 4294966272  ;;  %v787_v0 = vld [vmem:[#allocation4] sm:$0xf]  ;;  %v1020_v1 = vld [vmem:[#allocation4 + $0x4] sm:$0xf0] }
  0x1e   :  { %v125_v2 = vld [vmem:[#allocation2] sm:$0xff]  ;;  %v788_v3 = vor.u32 %v1020_v1, %v787_v0  ;;  %v1019_v4 = vld [vmem:[#allocation4 + $0x4] sm:$0xf]  ;;  %v789_v5 = vld [vmem:[#allocation4 + $0x8] sm:$0xf0]  ;;  %vm145_vm0 = vcmask 130048  }
  0x1f   :  { %v126_v6 = vpack.c.bf16 %v125_v2, %v125_v2  ;;  %v792_v7 = vor.u32 %v1019_v4, %v789_v5  ;;  %v853_v8 = vld [vmem:[#allocation7 + $0x70] sm:$0xf]  ;;  %v1036_v9 = vld [vmem:[#allocation7 + $0x74] sm:$0xf0]  ;;  %v1035_v13 = vld [vmem:[#allocation7 + $0x74] sm:$0xf] }
  0x20   :  { %156 = vmatpush.bf16.msra.mxu1 %v788_v3  ;;  %v917_v10 = vld [vmem:[#allocation7 + $0xf0] sm:$0xf]  ;;  %v854_v11 = vor.u32 %v1036_v9, %v853_v8  ;;  %v1052_v12 = vld [vmem:[#allocation7 + $0xf4] sm:$0xf0]  ;;  %v855_v14 = vld [vmem:[#allocation7 + $0x78] sm:$0xf0] }
  0x21   :  { %v918_v15 = vor.u32 %v1052_v12, %v917_v10  ;;  %v858_v16 = vor.u32 %v1035_v13, %v855_v14  ;;  %v1051_v17 = vld [vmem:[#allocation7 + $0xf4] sm:$0xf]  ;;  %v919_v18 = vld [vmem:[#allocation7 + $0xf8] sm:$0xf0]  ;;  %v845_v20 = vld [vmem:[#allocation7 + $0x60] sm:$0xf] }
  0x22   :  { %392 = vmatpush.bf16.msra.mxu2 %v854_v11  ;;  %v922_v19 = vor.u32 %v1051_v17, %v919_v18  ;;  %v1034_v21 = vld [vmem:[#allocation7 + $0x64] sm:$0xf0]  ;;  %v909_v22 = vld [vmem:[#allocation7 + $0xe0] sm:$0xf]  ;;  %v1033_v25 = vld [vmem:[#allocation7 + $0x64] sm:$0xf] }
  0x23   :  { %793 = vmatmul.msk.bf16.vlgmr.msra.gmra.mxu1 %vm145_vm0, %v126_v6  ;;  %405 = vmatpush.bf16.msra.mxu3 %v918_v15  ;;  %v846_v23 = vor.u32 %v1034_v21, %v845_v20  ;;  %v1050_v24 = vld [vmem:[#allocation7 + $0xe4] sm:$0xf0]  ;;  %v847_v26 = vld [vmem:[#allocation7 + $0x68] sm:$0xf0]  ;;  %v1049_v29 = vld [vmem:[#allocation7 + $0xe4] sm:$0xf] }
  0x24   :  { %169 = vmatpush.bf16.msrb.mxu1 %v792_v7  ;;  %418 = vmatpush.bf16.msra.mxu0 %v858_v16  ;;  %v910_v27 = vor.u32 %v1050_v24, %v909_v22  ;;  %v850_v28 = vor.u32 %v1033_v25, %v847_v26  ;;  %v911_v30 = vld [vmem:[#allocation7 + $0xe8] sm:$0xf0]  ;;  %v837_v32 = vld [vmem:[#allocation7 + $0x50] sm:$0xf]  ;;  %v1032_v33 = vld [vmem:[#allocation7 + $0x54] sm:$0xf0] }
  0x25   :  { %v914_v31 = vor.u32 %v1049_v29, %v911_v30  ;;  %v901_v34 = vld [vmem:[#allocation7 + $0xd0] sm:$0xf]  ;;  %v838_v35 = vor.u32 %v1032_v33, %v837_v32  ;;  %v1048_v36 = vld [vmem:[#allocation7 + $0xd4] sm:$0xf0]  ;;  %v1031_v37 = vld [vmem:[#allocation7 + $0x54] sm:$0xf] }
  0x26   :  { %393 = vmatpush.bf16.msra.mxu2 %v846_v23  ;;  %v839_v38 = vld [vmem:[#allocation7 + $0x58] sm:$0xf0]  ;;  %v902_v39 = vor.u32 %v1048_v36, %v901_v34  ;;  %v1047_v41 = vld [vmem:[#allocation7 + $0xd4] sm:$0xf]  ;;  %v829_v44 = vld [vmem:[#allocation7 + $0x40] sm:$0xf] }
  0x27   :  { %406 = vmatpush.bf16.msra.mxu3 %v910_v27  ;;  %v842_v40 = vor.u32 %v1031_v37, %v839_v38  ;;  %v903_v42 = vld [vmem:[#allocation7 + $0xd8] sm:$0xf0]  ;;  %v1030_v45 = vld [vmem:[#allocation7 + $0x44] sm:$0xf0]  ;;  %v893_v46 = vld [vmem:[#allocation7 + $0xc0] sm:$0xf] }
  0x28   :  { %431 = vmatpush.bf16.msra.mxu1 %v922_v19  ;;  %419 = vmatpush.bf16.msra.mxu0 %v850_v28  ;;  %v906_v43 = vor.u32 %v1047_v41, %v903_v42  ;;  %v830_v47 = vor.u32 %v1030_v45, %v829_v44  ;;  %v1046_v48 = vld [vmem:[#allocation7 + $0xc4] sm:$0xf0]  ;;  %v1029_v49 = vld [vmem:[#allocation7 + $0x44] sm:$0xf]  ;;  %v831_v50 = vld [vmem:[#allocation7 + $0x48] sm:$0xf0] }
  0x29   :  { %v894_v51 = vor.u32 %v1046_v48, %v893_v46  ;;  %v834_v52 = vor.u32 %v1029_v49, %v831_v50  ;;  %v1045_v53 = vld [vmem:[#allocation7 + $0xc4] sm:$0xf]  ;;  %v895_v54 = vld [vmem:[#allocation7 + $0xc8] sm:$0xf0]  ;;  %v821_v55 = vld [vmem:[#allocation7 + $0x30] sm:$0xf] }
  0x2a   :  { %394 = vmatpush.bf16.msra.mxu2 %v838_v35  ;;  %v898_v56 = vor.u32 %v1045_v53, %v895_v54  ;;  %v1028_v57 = vld [vmem:[#allocation7 + $0x34] sm:$0xf0]  ;;  %v885_v58 = vld [vmem:[#allocation7 + $0xb0] sm:$0xf]  ;;  %v1027_v62 = vld [vmem:[#allocation7 + $0x34] sm:$0xf] }
  0x2b   :  { %407 = vmatpush.bf16.msra.mxu3 %v902_v39  ;;  %v1044_v59 = vld [vmem:[#allocation7 + $0xb4] sm:$0xf0]  ;;  %v822_v60 = vor.u32 %v1028_v57, %v821_v55  ;;  %v823_v63 = vld [vmem:[#allocation7 + $0x38] sm:$0xf0]  ;;  %v1043_v0 = vld [vmem:[#allocation7 + $0xb4] sm:$0xf] }
  0x2c   :  { %432 = vmatpush.bf16.msra.mxu1 %v914_v31  ;;  %420 = vmatpush.bf16.msra.mxu0 %v842_v40  ;;  %v886_v61 = vor.u32 %v1044_v59, %v885_v58  ;;  %v826_v1 = vor.u32 %v1027_v62, %v823_v63  ;;  %v887_v2 = vld [vmem:[#allocation7 + $0xb8] sm:$0xf0]  ;;  %v813_v3 = vld [vmem:[#allocation7 + $0x20] sm:$0xf]  ;;  %v1026_v4 = vld [vmem:[#allocation7 + $0x24] sm:$0xf0] }
  0x2d   :  { %v890_v5 = vor.u32 %v1043_v0, %v887_v2  ;;  %v1042_v7 = vld [vmem:[#allocation7 + $0xa4] sm:$0xf0]  ;;  %v1025_v8 = vld [vmem:[#allocation7 + $0x24] sm:$0xf]  ;;  %v814_v10 = vor.u32 %v1026_v4, %v813_v3  ;;  %v815_v11 = vld [vmem:[#allocation7 + $0x28] sm:$0xf0] }
  0x2e   :  { %395 = vmatpush.bf16.msra.mxu2 %v830_v47  ;;  %v1041_v12 = vld [vmem:[#allocation7 + $0xa4] sm:$0xf]  ;;  %v879_v13 = vld [vmem:[#allocation7 + $0xa8] sm:$0xf0]  ;;  %v818_v15 = vor.u32 %v1025_v8, %v815_v11  ;;  %v805_v16 = vld [vmem:[#allocation7 + $0x10] sm:$0xf] }
  0x2f   :  { %408 = vmatpush.bf16.msra.mxu3 %v894_v51  ;;  %v1024_v17 = vld [vmem:[#allocation7 + $0x14] sm:$0xf0]  ;;  %v869_v18 = vld [vmem:[#allocation7 + $0x90] sm:$0xf]  ;;  %v882_v19 = vor.u32 %v1041_v12, %v879_v13  ;;  %v1023_v21 = vld [vmem:[#allocation7 + $0x14] sm:$0xf] }
  0x30   :  { %433 = vmatpush.bf16.msra.mxu1 %v906_v43  ;;  %421 = vmatpush.bf16.msra.mxu0 %v834_v52  ;;  %v1040_v20 = vld [vmem:[#allocation7 + $0x94] sm:$0xf0]  ;;  %v807_v22 = vld [vmem:[#allocation7 + $0x18] sm:$0xf0]  ;;  %v1039_v23 = vld [vmem:[#allocation7 + $0x94] sm:$0xf]  ;;  %v806_v25 = vor.u32 %v1024_v17, %v805_v16 }
  0x31   :  { %v871_v24 = vld [vmem:[#allocation7 + $0x98] sm:$0xf0]  ;;  %v870_v26 = vor.u32 %v1040_v20, %v869_v18  ;;  %v810_v27 = vor.u32 %v1023_v21, %v807_v22  ;;  %v797_v28 = vld [vmem:[#allocation7] sm:$0xf]  ;;  %v1022_v29 = vld [vmem:[#allocation7 + $0x4] sm:$0xf0] }
  0x32   :  { %396 = vmatpush.bf16.msra.mxu2 %v822_v60  ;;  %v861_v30 = vld [vmem:[#allocation7 + $0x80] sm:$0xf]  ;;  %v874_v31 = vor.u32 %v1039_v23, %v871_v24  ;;  %v1038_v32 = vld [vmem:[#allocation7 + $0x84] sm:$0xf0]  ;;  %v1021_v33 = vld [vmem:[#allocation7 + $0x4] sm:$0xf]  ;;  %v798_v39 = vor.u32 %v1022_v29, %v797_v28 }
  0x33   :  { %794 = vmatmul.msk.bf16.vlgmr.msrb.gmra.mxu1 %vm145_vm0, %v126_v6  ;;  %v877_v6 = vld [vmem:[#allocation7 + $0xa0] sm:$0xf]  ;;  %409 = vmatpush.bf16.msra.mxu3 %v886_v61  ;;  %v799_v34 = vld [vmem:[#allocation7 + $0x8] sm:$0xf0]  ;;  %v1037_v35 = vld [vmem:[#allocation7 + $0x84] sm:$0xf]  ;;  %v862_v40 = vor.u32 %v1038_v32, %v861_v30 }
  0x34   :  { %434 = vmatpush.bf16.msra.mxu1 %v898_v56  ;;  %422 = vmatpush.bf16.msra.mxu0 %v826_v1  ;;  %v878_v14 = vor.u32 %v1042_v7, %v877_v6  ;;  %v863_v36 = vld [vmem:[#allocation7 + $0x88] sm:$0xf0]  ;;  %v129_v37 = vld [vmem:[#allocation6] sm:$0x3]  ;;  %v802_v41 = vor.u32 %v1021_v33, %v799_v34  ;;  %v1059_v6 = vld [vmem:[#allocation9 + $0x30] sm:$0xff]  ;;  %vm716_vm1 = vcmask 1040384  }
  0x35   :  { %v866_v42 = vor.u32 %v1037_v35, %v863_v36  ;;  %v131_v43 = vperm.slane %v129_v37, 0  ;;  %v132_v44 = vperm.slane %v129_v37, 1  ;;  %v1060_v4 = vld [vmem:[#allocation9 + $0x38] sm:$0xff]  ;;  %v1067_v7 = vld [vmem:[#allocation9 + $0x70] sm:$0xff]  ;;  %v1058_v8 = vld [vmem:[#allocation9 + $0x28] sm:$0xff] }
  0x36   :  { %397 = vmatpush.bf16.msra.mxu2 %v814_v10  ;;  %v1057_v10 = vld [vmem:[#allocation9 + $0x20] sm:$0xff]  ;;  %v1056_v12 = vld [vmem:[#allocation9 + $0x18] sm:$0xff]  ;;  %v1054_v17 = vld [vmem:[#allocation9 + $0x8] sm:$0xff] }
  0x37   :  { %410 = vmatpush.bf16.msra.mxu3 %v878_v14  ;;  %v1065_v11 = vld [vmem:[#allocation9 + $0x60] sm:$0xff]  ;;  %v1064_v13 = vld [vmem:[#allocation9 + $0x58] sm:$0xff]  ;;  %v1055_v14 = vld [vmem:[#allocation9 + $0x10] sm:$0xff] }
  0x38   :  { %435 = vmatpush.bf16.msra.mxu1 %v890_v5  ;;  %423 = vmatpush.bf16.msra.mxu0 %v818_v15  ;;  %v1068_v5 = vld [vmem:[#allocation9 + $0x78] sm:$0xff]  ;;  %v1063_v15 = vld [vmem:[#allocation9 + $0x50] sm:$0xff]  ;;  %v226_v16 = vld [vmem:[%s1349_s4] sm:$0x3] }
  0x39   :  { %v1062_v18 = vld [vmem:[#allocation9 + $0x48] sm:$0xff]  ;;  %v1053_v20 = vld [vmem:[#allocation9] sm:$0xff] }
  0x3a   :  { %398 = vmatpush.bf16.msra.mxu2 %v806_v25  ;;  %v1061_v21 = vld [vmem:[#allocation9 + $0x40] sm:$0xff]  ;;  %v228_v25 = vperm.slane %v226_v16, 0 }
  0x3b   :  { %411 = vmatpush.bf16.msra.mxu3 %v870_v26 }
  0x3c   :  { %436 = vmatpush.bf16.msra.mxu1 %v882_v19  ;;  %424 = vmatpush.bf16.msra.mxu0 %v810_v27  ;;  %v229_v19 = vperm.slane %v226_v16, 1  ;;  %v1090_v16 = vld [vmem:[%s1353_s8] ss:$0 sm:$0xff] }
  0x3e   :  { %399 = vmatpush.bf16.msra.mxu2 %v798_v39 }
  0x3f   :  { %412 = vmatpush.bf16.msra.mxu3 %v862_v40 }
  0x40   :  { %437 = vmatpush.bf16.msra.mxu1 %v874_v31  ;;  %425 = vmatpush.bf16.msra.mxu0 %v802_v41 }
  0x42   :  { %595 = vmatpush.bf16.msrb.mxu2 %v1060_v4 }
  0x43   :  { %608 = vmatpush.bf16.msrb.mxu3 %v1068_v5 }
  0x44   :  { %438 = vmatpush.bf16.msra.mxu1 %v866_v42 }
  0x46   :  { %596 = vmatpush.bf16.msrb.mxu2 %v1059_v6 }
  0x47   :  { %609 = vmatpush.bf16.msrb.mxu3 %v1067_v7 }
  0x4a   :  { %597 = vmatpush.bf16.msrb.mxu2 %v1058_v8 }
  0x4e   :  { %598 = vmatpush.bf16.msrb.mxu2 %v1057_v10 }
  0x52   :  { %599 = vmatpush.bf16.msrb.mxu2 %v1056_v12 }
  0x56   :  { %600 = vmatpush.bf16.msrb.mxu2 %v1055_v14 }
  0x5a   :  { %601 = vmatpush.bf16.msrb.mxu2 %v1054_v17 }
  0x5e   :  { %602 = vmatpush.bf16.msrb.mxu2 %v1053_v20 }
  0xa0   :  { %v158_v9 = vpop.f32.mrf.mxu1 }
  0xa1   :  { %v159_v45 = vadd.f32 %v158_v9, %v131_v43  ;;  %v1066_v9 = vld [vmem:[#allocation9 + $0x68] sm:$0xff] }
  0xa2   :  { %610 = vmatpush.bf16.msrb.mxu3 %v1066_v9 }
  0xa3   :  { %v175_v48 = vmul.f32 0.5, %v159_v45 }
  0xa6   :  { %611 = vmatpush.bf16.msrb.mxu3 %v1065_v11 }
  0xa8   :  { %v160_v38 = vpop.f32.mrf.mxu1 }
  0xaa   :  { %612 = vmatpush.bf16.msrb.mxu3 %v1064_v13 }
  0xae   :  { %613 = vmatpush.bf16.msrb.mxu3 %v1063_v15 }
  0xb0   :  { %v171_v46 = vpop.f32.mrf.mxu1 }
  0xb1   :  { %v172_v47 = vadd.f32 %v171_v46, %v132_v44 }
  0xb2   :  { %614 = vmatpush.bf16.msrb.mxu3 %v1062_v18 }
  0xb3   :  { %v176_v49 = vmul.f32 0.5, %v172_v47 }
  0xb5   :  { %v177_v50 = vpack.c.bf16 %v176_v49, %v175_v48 }
  0xb6   :  { %615 = vmatpush.bf16.msrb.mxu3 %v1061_v21 }
  0xb7   :  { %v178_v51 = vunpack.c.l.bf16 %v177_v50  ;;  %v179_v52 = vunpack.c.h.bf16 %v177_v50 }
  0xb8   :  { %v173_v53 = vpop.f32.mrf.mxu1 }
  0xb9   :  { %1091 = vtanh.f32 %v178_v51 }
  0xba   :  { %1093 = vtanh.f32 %v179_v52 }
  0xbf   :  { %v1092_v54 = vpop.eup %1091 }
  0xc0   :  { %v1094_v55 = vpop.eup %1093 }
  0xc1   :  { %v182_v56 = vpack.c.bf16 %v1094_v55, %v1092_v54  ;;  %v1076_v54 = vld [vmem:[#allocation10 + $0x38] sm:$0xff]  ;;  %v1075_v55 = vld [vmem:[#allocation10 + $0x30] sm:$0xff] }
  0xc2   :  { %700 = vmatpush.bf16.msrb.mxu0 %v1076_v54 }
  0xc3   :  { %v183_v57 = vunpack.c.l.bf16 %v182_v56  ;;  %v184_v58 = vunpack.c.h.bf16 %v182_v56  ;;  %v1074_v56 = vld [vmem:[#allocation10 + $0x28] sm:$0xff] }
  0xc5   :  { %v185_v59 = vmul.f32 0.5, %v183_v57  ;;  %v186_v60 = vmul.f32 0.5, %v184_v58  ;;  %v1073_v57 = vld [vmem:[#allocation10 + $0x20] sm:$0xff]  ;;  %v1072_v58 = vld [vmem:[#allocation10 + $0x18] sm:$0xff] }
  0xc6   :  { %701 = vmatpush.bf16.msrb.mxu0 %v1075_v55 }
  0xc7   :  { %v187_v61 = vpack.c.bf16 %v186_v60, %v185_v59  ;;  %v1071_v59 = vld [vmem:[#allocation10 + $0x10] sm:$0xff]  ;;  %v1070_v60 = vld [vmem:[#allocation10 + $0x8] sm:$0xff] }
  0xc9   :  { %v188_v62 = vunpack.c.l.bf16 %v187_v61  ;;  %v189_v63 = vunpack.c.h.bf16 %v187_v61  ;;  %v1069_v61 = vld [vmem:[#allocation10] sm:$0xff] }
  0xca   :  { %702 = vmatpush.bf16.msrb.mxu0 %v1074_v56 }
  0xcb   :  { %v190_v0 = vadd.f32 0.5, %v188_v62  ;;  %v191_v1 = vadd.f32 0.5, %v189_v63  ;;  %v1089_v62 = vld [vmem:[%s1351_s6] ss:$0 sm:$0xff] }
  0xcd   :  { %v192_v2 = vpack.c.bf16 %v190_v0, %v190_v0  ;;  %v193_v3 = vpack.c.bf16 %v191_v1, %v191_v1 }
  0xce   :  { %703 = vmatpush.bf16.msrb.mxu0 %v1073_v57 }
  0xcf   :  { %400 = vmatmul.bf16.vlgmr.msra.gmra.mxu2 %v192_v2  ;;  %413 = vmatmul.bf16.vlgmr.msra.gmra.mxu3 %v193_v3 }
  0xd0   :  { %426 = vmatmul.bf16.vlgmr.msra.gmra.mxu0 %v192_v2  ;;  %439 = vmatmul.bf16.vlgmr.msra.gmra.mxu1 %v193_v3 }
  0xd2   :  { %704 = vmatpush.bf16.msrb.mxu0 %v1072_v58 }
  0xd6   :  { %705 = vmatpush.bf16.msrb.mxu0 %v1071_v59 }
  0xda   :  { %706 = vmatpush.bf16.msrb.mxu0 %v1070_v60 }
  0xde   :  { %707 = vmatpush.bf16.msrb.mxu0 %v1069_v61 }
 0x14d   :  { %v427_v22 = vpop.f32.mrf.mxu0  ;;  %v440_v23 = vpop.f32.mrf.mxu1 }
 0x14e   :  { %v428_v24 = vadd.f32 %v427_v22, %v229_v19 }
 0x150   :  { %v441_v28 = vadd.f32 %v440_v23, %v428_v24 }
 0x152   :  { %v401_v26 = vpop.f32.mrf.mxu2  ;;  %v414_v27 = vpop.f32.mrf.mxu3  ;;  %v445_v33 = vmul.f32 0.5, %v441_v28 }
 0x153   :  { %v402_v29 = vadd.f32 %v401_v26, %v228_v25 }
 0x155   :  { %v415_v30 = vadd.f32 %v414_v27, %v402_v29  ;;  %v429_v31 = vpop.f32.mrf.mxu0  ;;  %v442_v32 = vpop.f32.mrf.mxu1 }
 0x157   :  { %v444_v34 = vmul.f32 0.5, %v415_v30 }
 0x159   :  { %v446_v35 = vpack.c.bf16 %v445_v33, %v444_v34 }
 0x15a   :  { %v403_v36 = vpop.f32.mrf.mxu2  ;;  %v416_v37 = vpop.f32.mrf.mxu3 }
 0x15b   :  { %v447_v38 = vunpack.c.l.bf16 %v446_v35  ;;  %v448_v39 = vunpack.c.h.bf16 %v446_v35 }
 0x15d   :  { %1095 = vtanh.f32 %v447_v38 }
 0x15e   :  { %1097 = vtanh.f32 %v448_v39 }
 0x163   :  { %v1096_v40 = vpop.eup %1095 }
 0x164   :  { %v1098_v41 = vpop.eup %1097 }
 0x165   :  { %v451_v42 = vpack.c.bf16 %v1098_v41, %v1096_v40 }
 0x167   :  { %v452_v43 = vunpack.c.l.bf16 %v451_v42  ;;  %v453_v44 = vunpack.c.h.bf16 %v451_v42 }
 0x169   :  { %v454_v45 = vmul.f32 0.5, %v452_v43  ;;  %v455_v46 = vmul.f32 0.5, %v453_v44 }
 0x16b   :  { %v456_v47 = vpack.c.bf16 %v455_v46, %v454_v45 }
 0x16d   :  { %v457_v48 = vunpack.c.l.bf16 %v456_v47  ;;  %v458_v49 = vunpack.c.h.bf16 %v456_v47 }
 0x16f   :  { %v459_v50 = vadd.f32 0.5, %v457_v48  ;;  %v460_v51 = vadd.f32 0.5, %v458_v49 }
 0x171   :  { %v461_v52 = vpack.c.bf16 %v459_v50, %v459_v50  ;;  %v462_v53 = vpack.c.bf16 %v460_v51, %v460_v51 }
 0x173   :  { %603 = vmatmul.bf16.vlgmr.msrb.gmra.mxu2 %v461_v52  ;;  %616 = vmatmul.bf16.vlgmr.msrb.gmra.mxu3 %v462_v53 }
 0x1f6   :  { %v604_v63 = vpop.f32.mrf.mxu2  ;;  %v617_v0 = vpop.f32.mrf.mxu3 }
 0x1f7   :  { %v605_v1 = vadd.f32 %v1089_v62, %v604_v63 }
 0x1f9   :  { %v618_v2 = vadd.f32 %v617_v0, %v605_v1 }
 0x1fb   :  { %v621_v3 = vmul.f32 0.5, %v618_v2 }
 0x1fd   :  { %v622_v4 = vpack.c.bf16 %v621_v3, %v621_v3 }
 0x1fe   :  { %v606_v5 = vpop.f32.mrf.mxu2  ;;  %v619_v6 = vpop.f32.mrf.mxu3 }
 0x1ff   :  { %v623_v7 = vunpack.c.l.bf16 %v622_v4 }
 0x201   :  { %1099 = vtanh.f32 %v623_v7 }
 0x207   :  { %v1100_v8 = vpop.eup %1099 }
 0x208   :  { %v625_v9 = vpack.c.bf16 %v1100_v8, %v1100_v8 }
 0x20a   :  { %v626_v10 = vunpack.c.l.bf16 %v625_v9 }
 0x20c   :  { %v627_v11 = vmul.f32 0.5, %v626_v10 }
 0x20e   :  { %v628_v12 = vpack.c.bf16 %v627_v11, %v627_v11 }
 0x210   :  { %v629_v13 = vunpack.c.l.bf16 %v628_v12 }
 0x212   :  { %v630_v14 = vadd.f32 0.5, %v629_v13 }
 0x214   :  { %v631_v15 = vpack.c.bf16 %v630_v14, %v630_v14 }
 0x216   :  { %708 = vmatmul.bf16.vlgmr.msrb.gmra.mxu0 %v631_v15 }
 0x293   :  { %v709_v17 = vpop.f32.mrf.mxu0 }
 0x294   :  { %v710_v18 = vadd.f32 %v1090_v16, %v709_v17 }
 0x296   :  { %v713_v19 = vpack.c.bf16 %v710_v18, %v710_v18 }
 0x298   :  { %v715_v20 = vrot.slane %v713_v19, 3 }
 0x29a   :  { %v719_v21 = vsel %vm716_vm1, %v713_v19, %v715_v20 }
 0x29b   :  { %736 = vst [vmem:[#allocation12] sm:$0x1] %v719_v21  ;;  %v711_v22 = vpop.f32.mrf.mxu0 }
 0x2a2   :  { %v758_v23 = vld [vmem:[#allocation12] sm:$0x1] }
 0x2a3   :  { %759 = vst [vmem:[%s1354_s9] sm:$0x1] %v758_v23 }
 0x2a4   :  { %777 = vsyncpa [#allocation3], 1 }
 0x2a5   :  { %778 = vsyncpa [#allocation5], 1 }
 0x2a6   :  { %779 = vsyncpa [#allocation8], 1 }
 0x2a7   :  { %780 = vsyncpa [#allocation11], 1 }

</bundles_post_ra>
